<compile_context>
chip_gen: v7x
topology: tpu7x:2x2x1
jax: 0.10.0
libtpu: 0.0.40
codegen_flags: <defaults>
</compile_context>

<pallas_src>
import math

import jax
import jax.numpy as jnp
from jax import lax
from jax.experimental import pallas as pl
from jax.experimental.pallas import tpu as pltpu


def _round_up(x, m):
    return ((x + m - 1) // m) * m


def _gelu_exact(x):
    # PyTorch nn.GELU() default is the exact erf-based GELU.
    return 0.5 * x * (1.0 + lax.erf(x * (1.0 / math.sqrt(2.0))))


def _mlp_kernel(xt_ref, w1_ref, b1_ref, w2_ref, b2_ref, o_ref):
    xt = xt_ref[...]                                       # [input_dim, bb]
    h = jnp.dot(w1_ref[...], xt,
                preferred_element_type=jnp.float32) + b1_ref[...]
    h = _gelu_exact(h)                                     # [hidden, bb]
    y = jnp.dot(w2_ref[...], h,
                preferred_element_type=jnp.float32) + b2_ref[...]
    y = _gelu_exact(y)                                     # [out_dim, bb]
    o_ref[...] = y.astype(o_ref.dtype)


def fc_small_forward(x, w1, b1, w2, b2, *, block_b=1024):
    """Forward pass of FC_small_model.

    x:  [B, input_dim] float32
    w1: [hidden, input_dim]  (PyTorch Linear layout)
    b1: [hidden]
    w2: [out_dim, hidden]
    b2: [out_dim]
    Returns [B, out_dim] float32.
    """
    B, input_dim = x.shape
    hidden = w1.shape[0]
    out_dim = w2.shape[0]

    # --- choose the batch (lane) tile ---------------------------------------
    # Multiple of 128, at most block_b; keep >= 2 grid steps when the batch
    # spans >= 2 lane tiles so v7x's two TensorCores both get work.
    n128 = max(1, _round_up(B, 128) // 128)
    bb = max(128, (min(block_b, n128 * 128) // 128) * 128)
    if n128 >= 2:
        bb = min(bb, ((n128 + 1) // 2) * 128)
    grid_b = pl.cdiv(B, bb)
    B_pad = grid_b * bb

    # --- batch-on-lanes layout + ragged-batch padding ------------------------
    x_t = jnp.pad(x.T, ((0, 0), (0, B_pad - B)))           # [input_dim, B_pad]
    b1_col = b1.reshape(hidden, 1)
    b2_col = b2.reshape(out_dim, 1)

    out_t = pl.pallas_call(
        _mlp_kernel,
        out_shape=jax.ShapeDtypeStruct((out_dim, B_pad), jnp.float32),
        grid_spec=pltpu.PrefetchScalarGridSpec(
            num_scalar_prefetch=0,
            grid=(grid_b,),
            in_specs=[
                pl.BlockSpec((input_dim, bb), lambda i: (0, i)),     # x^T tile
                pl.BlockSpec((hidden, input_dim), lambda i: (0, 0)),  # W1 (full)
                pl.BlockSpec((hidden, 1), lambda i: (0, 0)),          # b1 (full)
                pl.BlockSpec((out_dim, hidden), lambda i: (0, 0)),    # W2 (full)
                pl.BlockSpec((out_dim, 1), lambda i: (0, 0)),         # b2 (full)
            ],
            out_specs=pl.BlockSpec((out_dim, bb), lambda i: (0, i)),
        ),
        compiler_params=pltpu.CompilerParams(
            dimension_semantics=("parallel",)),
    )(x_t, w1, b1_col, w2, b2_col)

    return out_t[:, :B].T                                  # [B, out_dim]


def init_params(key, input_dim, hidden=5, out_dim=2):
    """Deterministic init matching PyTorch Linear ([out, in] weight layout)."""
    k1, k2, k3, k4 = jax.random.split(key, 4)
    bound1 = 1.0 / math.sqrt(input_dim)
    bound2 = 1.0 / math.sqrt(hidden)
    w1 = jax.random.uniform(k1, (hidden, input_dim), jnp.float32, -bound1, bound1)
    b1 = jax.random.uniform(k2, (hidden,), jnp.float32, -bound1, bound1)
    w2 = jax.random.uniform(k3, (out_dim, hidden), jnp.float32, -bound2, bound2)
    b2 = jax.random.uniform(k4, (out_dim,), jnp.float32, -bound2, bound2)
    return w1, b1, w2, b2


def reference_forward(x, w1, b1, w2, b2):
    h = _gelu_exact(x @ w1.T + b1)
    return _gelu_exact(h @ w2.T + b2)


if __name__ == "__main__":
    key = jax.random.PRNGKey(0)
    kx, kp = jax.random.split(key)

    batch = 300        # ragged (not a multiple of 128) to exercise padding
    input_dim = 16     # number of time lags / sequence length
    x = jax.random.normal(kx, (batch, input_dim), jnp.float32)

    w1, b1, w2, b2 = init_params(kp, input_dim)

    out = fc_small_forward(x, w1, b1, w2, b2)
    out = jax.block_until_ready(out)

    ref = reference_forward(x, w1, b1, w2, b2)
    assert out.shape == (batch, 2)
    assert jnp.allclose(out, ref, atol=1e-5, rtol=1e-5)

    print("KERNEL_OK")
</pallas_src>

<mosaic_0001>
module attributes {stable_mosaic.version = 11 : i64} {
  func.func @_mlp_kernel(%arg0: i32, %arg1: memref<16x256xf32, #tpu.memory_space<vmem>>, %arg2: memref<5x16xf32, #tpu.memory_space<vmem>>, %arg3: memref<5x1xf32, #tpu.memory_space<vmem>>, %arg4: memref<2x5xf32, #tpu.memory_space<vmem>>, %arg5: memref<2x1xf32, #tpu.memory_space<vmem>>, %arg6: memref<2x256xf32, #tpu.memory_space<vmem>>) attributes {dimension_semantics = [#tpu.dimension_semantics<parallel>], iteration_bounds = array<i64: 2>, scalar_prefetch = 0 : i64, scratch_operands = 0 : i64, tpu.core_type = #tpu.core_type<tc>, window_params = [{transform_indices = @transform_0, window_bounds = array<i64: 16, 256>}, {pipeline_mode = #tpu.pipeline_mode<synchronous>, transform_indices = @transform_1, window_bounds = array<i64: 5, 16>}, {pipeline_mode = #tpu.pipeline_mode<synchronous>, transform_indices = @transform_2, window_bounds = array<i64: 5, 1>}, {pipeline_mode = #tpu.pipeline_mode<synchronous>, transform_indices = @transform_3, window_bounds = array<i64: 2, 5>}, {pipeline_mode = #tpu.pipeline_mode<synchronous>, transform_indices = @transform_4, window_bounds = array<i64: 2, 1>}, {transform_indices = @transform_5, window_bounds = array<i64: 2, 256>}]} {
    %c0 = arith.constant 0 : index
    %c0_0 = arith.constant 0 : index
    %0 = vector.load %arg1[%c0, %c0_0] : memref<16x256xf32, #tpu.memory_space<vmem>>, vector<16x256xf32>
    %c0_1 = arith.constant 0 : index
    %c0_2 = arith.constant 0 : index
    %1 = vector.load %arg2[%c0_1, %c0_2] : memref<5x16xf32, #tpu.memory_space<vmem>>, vector<5x16xf32>
    %cst = arith.constant dense<0.000000e+00> : vector<5x256xf32>
    %2 = tpu.matmul %1, %0, %cst {dimension_numbers = #tpu.dot_dimension_numbers<[1], [0], [0], [1], [0, 0, 1, 1], [], []>} : vector<5x16xf32>, vector<16x256xf32>, vector<5x256xf32> -> vector<5x256xf32>
    %c0_3 = arith.constant 0 : index
    %c0_4 = arith.constant 0 : index
    %3 = vector.load %arg3[%c0_3, %c0_4] : memref<5x1xf32, #tpu.memory_space<vmem>>, vector<5x1xf32>
    %4 = vector.broadcast %3 : vector<5x1xf32> to vector<5x256xf32>
    %5 = arith.addf %2, %4 : vector<5x256xf32>
    %cst_5 = arith.constant 5.000000e-01 : f32
    %6 = vector.broadcast %cst_5 : f32 to vector<5x256xf32>
    %7 = arith.mulf %6, %5 : vector<5x256xf32>
    %cst_6 = arith.constant 0.707106769 : f32
    %8 = vector.broadcast %cst_6 : f32 to vector<5x256xf32>
    %9 = arith.mulf %5, %8 : vector<5x256xf32>
    %10 = math.erf %9 : vector<5x256xf32>
    %cst_7 = arith.constant 1.000000e+00 : f32
    %11 = vector.broadcast %cst_7 : f32 to vector<5x256xf32>
    %12 = arith.addf %11, %10 : vector<5x256xf32>
    %13 = arith.mulf %7, %12 : vector<5x256xf32>
    %c0_8 = arith.constant 0 : index
    %c0_9 = arith.constant 0 : index
    %14 = vector.load %arg4[%c0_8, %c0_9] : memref<2x5xf32, #tpu.memory_space<vmem>>, vector<2x5xf32>
    %cst_10 = arith.constant dense<0.000000e+00> : vector<2x256xf32>
    %15 = tpu.matmul %14, %13, %cst_10 {dimension_numbers = #tpu.dot_dimension_numbers<[1], [0], [0], [1], [0, 0, 1, 1], [], []>} : vector<2x5xf32>, vector<5x256xf32>, vector<2x256xf32> -> vector<2x256xf32>
    %c0_11 = arith.constant 0 : index
    %c0_12 = arith.constant 0 : index
    %16 = vector.load %arg5[%c0_11, %c0_12] : memref<2x1xf32, #tpu.memory_space<vmem>>, vector<2x1xf32>
    %17 = vector.broadcast %16 : vector<2x1xf32> to vector<2x256xf32>
    %18 = arith.addf %15, %17 : vector<2x256xf32>
    %cst_13 = arith.constant 5.000000e-01 : f32
    %19 = vector.broadcast %cst_13 : f32 to vector<2x256xf32>
    %20 = arith.mulf %19, %18 : vector<2x256xf32>
    %cst_14 = arith.constant 0.707106769 : f32
    %21 = vector.broadcast %cst_14 : f32 to vector<2x256xf32>
    %22 = arith.mulf %18, %21 : vector<2x256xf32>
    %23 = math.erf %22 : vector<2x256xf32>
    %cst_15 = arith.constant 1.000000e+00 : f32
    %24 = vector.broadcast %cst_15 : f32 to vector<2x256xf32>
    %25 = arith.addf %24, %23 : vector<2x256xf32>
    %26 = arith.mulf %20, %25 : vector<2x256xf32>
    %c0_16 = arith.constant 0 : index
    %c0_17 = arith.constant 0 : index
    %27 = vector.load %arg6[%c0_16, %c0_17] : memref<2x256xf32, #tpu.memory_space<vmem>>, vector<2x256xf32>
    tpu.vector_store %arg6[%c0_16, %c0_17], %26 {strides = array<i32>} : memref<2x256xf32, #tpu.memory_space<vmem>>, vector<2x256xf32>,
    return
  }
  func.func @transform_0(%arg0: i32) -> (i32, i32) {
    %c0_i32 = arith.constant 0 : i32
    %c0_i32_0 = arith.constant 0 : i32
    return %c0_i32, %arg0 : i32, i32
  }
  func.func @transform_1(%arg0: i32) -> (i32, i32) {
    %c0_i32 = arith.constant 0 : i32
    %c0_i32_0 = arith.constant 0 : i32
    %c0_i32_1 = arith.constant 0 : i32
    return %c0_i32, %c0_i32_0 : i32, i32
  }
  func.func @transform_2(%arg0: i32) -> (i32, i32) {
    %c0_i32 = arith.constant 0 : i32
    %c0_i32_0 = arith.constant 0 : i32
    %c0_i32_1 = arith.constant 0 : i32
    return %c0_i32, %c0_i32_0 : i32, i32
  }
  func.func @transform_3(%arg0: i32) -> (i32, i32) {
    %c0_i32 = arith.constant 0 : i32
    %c0_i32_0 = arith.constant 0 : i32
    %c0_i32_1 = arith.constant 0 : i32
    return %c0_i32, %c0_i32_0 : i32, i32
  }
  func.func @transform_4(%arg0: i32) -> (i32, i32) {
    %c0_i32 = arith.constant 0 : i32
    %c0_i32_0 = arith.constant 0 : i32
    %c0_i32_1 = arith.constant 0 : i32
    return %c0_i32, %c0_i32_0 : i32, i32
  }
  func.func @transform_5(%arg0: i32) -> (i32, i32) {
    %c0_i32 = arith.constant 0 : i32
    %c0_i32_0 = arith.constant 0 : i32
    return %c0_i32, %arg0 : i32, i32
  }
}

</mosaic_0001>

<bundles_post_ra>
// kernel: tpu_custom_call.1
= control target key start
LH: loop header
LB: loop body
LE: loop exit
PB: predicated region body
PF: predicated region fallthrough
CT: control target
= control target key end

     0   :  { %10 = vsyncpa [#allocation3], 0  ;;  %s932_s0 = inlined_call_operand.hbm [shape: f32[16,512], index: 0, kind: input, shape index: {}]   ;;  %s933_s1 = inlined_call_operand.vmem [shape: f32[5,16], index: 1, kind: input, shape index: {}]   ;;  %s934_s2 = inlined_call_operand.vmem [shape: f32[5,1], index: 2, kind: input, shape index: {}]   ;;  %s935_s3 = inlined_call_operand.vmem [shape: f32[2,5], index: 3, kind: input, shape index: {}]   ;;  %s936_s4 = inlined_call_operand.vmem [shape: f32[2,1], index: 4, kind: input, shape index: {}]   ;;  %s937_s5 = inlined_call_operand.hbm [shape: f32[2,512], index: 5, kind: output, shape index: {}]  }
   0x1   :  { %12 = vsyncpa [#allocation3 + $0x1], 0 }
   0x2   :  { %13 = vsyncpa [#allocation4], 0 }
   0x3   :  { %15 = vsyncpa [#allocation4 + $0x1], 0  ;;  %s757_s18 = smov 0   ;;  %s759_s19 = smov 0  }
   0x4   :  { %s761_s20 = smov 0   ;;  %s763_s21 = smov 0  }
   0x5 LB: > { %s778_s22 = sadd.s32 4294967295, %s718_s21   ;;  %s537_s23 = sadd.s32 4294967294, %s718_s21   ;;  %s718_s21 = sphi %s763_s21, %s951_s21   ;;  %s714_s20 = sphi %s761_s20, %s950_s20   ;;  %s710_s19 = sphi %s759_s19, %s949_s19   ;;  %s706_s18 = sphi %s757_s18, %s948_s18  }
   0x6   : > { %s782_s24 = sadd.s32 1, %s718_s21   ;;  %s28_s25 = sadd.s32 1, %s714_s20 }
   0x7   : > { %s25_s26 = ssub.s32 %s718_s21, %s782_s24  ;;  %p35_p0 = scmp.ne.s32.totalorder %s714_s20, %s710_s19 }
   0x8   : > { %p26_p1 = scmp.eq.s32.totalorder %s25_s26, 0  ;;  %p36_p2 = scmp.eq.s32.totalorder %s718_s21, 0 }
   0x9   : > { %p41_p3 = scmp.ne.s32.totalorder %s710_s19, %s706_s18  ;;  %p42_p4 = scmp.eq.s32.totalorder %s778_s22, 0 }
   0xa   : > { %s794_s27 = scalar_select %p26_p1, %s714_s20, %s28_s25  }
   0xb   : > { %p796_p5 = por %p36_p2, %p35_p0  ;;  %p800_p6 = por %p42_p4, %p41_p3 }
   0xc   : > { %p149_p7 = scmp.eq.s32.totalorder %s778_s22, 1  ;;  %p155_p8 = scmp.eq.s32.totalorder %s537_s23, 1 }
   0xd   : > { %p574_p10 = scmp.lt.s32.totalorder %s718_s21, 2  ;;  %s187_s7 = sand.u32 1, %s714_s20  }
   0xe   : > { %p807_p11 = por %p149_p7, %p35_p0  ;;  %p811_p12 = por %p155_p8, %p41_p3 }
   0xf   : > { %s556_s8 = sshll.u32 %s718_s21, 8  ;;  %s540_s9 = sshll.u32 %s187_s7, 5 }
  0x10   : > { %s941_s30 = scalar_select %p807_p11, 1, 0 }
  0x11   : > { %s942_s6 = scalar_select %p811_p12, 1, 0 }
  0x12   : > { %s820_s12 = scalar_lea.hbm %s932_s0, %s556_s8  ;;  %s191_s13 = scalar_lea.vmem [#allocation2], %s540_s9 }
  0x13   : > { %s198_s14 = sshll.u32 %s191_s13, 4  ;;  %p824_p13 = pnand %p574_p10, %p796_p5  ;;  %s828_s14 = int_to_ptr.vmem [resolvable:$true] %s198_s14 }
  0x14   : > { %s831_s16 = scalar_lea.sflag [#allocation3], %s187_s7  ;;  %s622_s17 = scalar_lea.hbm %s820_s12, 512 }
  0x15   : > { %p623_p1 = scmp.ne.s32.totalorder %s820_s12, %s622_s17  ;;  %p624_p2 = pneg %p824_p13 }
  0x16   : > { %s627_s26 = scalar_lea.hbm %s932_s0, 1024  ;;  %p628_p5 = scmp.lt.u32.totalorder %s820_s12, %s932_s0 }
  0x17   : > { %p625_p3 = pnand %p624_p2, %p623_p1  ;;  %p629_p7 = scmp.lt.u32.totalorder %s627_s26, %s622_s17 }
  0x18   : > { %p631_p10 = scmp.lt.u32.totalorder %s622_s17, %s820_s12 }
  0x19   : > { %p626_p4 = pneg %p625_p3  ;;  %p630_p8 = por %p629_p7, %p628_p5 }
  0x1b   : > { %p632_p9 = por %p631_p10, %p630_p8 }
  0x1d   : > { %p633_p0 = pnand %p632_p9, %p626_p4 }
  0x1f   : > { %636 = shalt.err (!%p633_p0)
}
  0x20   : > { %s637_s7 = scalar_lea.vmem %s828_s14, 512  ;;  %s720_s9 = smov [#allocation2]  }
  0x21   : > { %p638_p1 = scmp.ne.s32.totalorder %s828_s14, %s637_s7  ;;  %s642_s10 = sshll.u32 %s720_s9, 4  ;;  %s643_s10 = int_to_ptr.vmem [resolvable:$false] %s642_s10 }
  0x22   : > { %s644_s11 = scalar_lea.vmem %s643_s10, 1024  ;;  %p645_p11 = scmp.lt.s32.totalorder %s828_s14, %s643_s10 }
  0x23   : > { %p640_p3 = pnand %p638_p1, %p624_p2  ;;  %p646_p5 = scmp.lt.s32.totalorder %s644_s11, %s637_s7 }
  0x25   : > { %p641_p12 = pneg %p640_p3  ;;  %p647_p7 = por %p646_p5, %p645_p11 }
  0x27   : > { %p648_p8 = pnand %p647_p7, %p641_p12 }
  0x29   : > { %651 = shalt.err (!%p648_p8)
}
  0x2a   : > { %s721_s13 = smov 512   ;;  %s722_s17 = smov 256  }
  0x2b   : > { %s723_s23 = smov 16   ;;  %p206_p9 = scmp.lt.s32.totalorder %s718_s21, 3 }
  0x2c   : > { %569 = dma.hbm_to_vmem [thread:$0]  (!%p824_p13), %s820_s12, 512, %s828_s14, %s831_s16, %s721_s13, %s722_s17, %s723_s23  }
  0x2d   : > { %p944_p0 = scmp.ge.s32.totalorder %s718_s21, 1 }
  0x2f   : > { %p207_p2 = pnand %p944_p0, %p206_p9 }
  0x30   : > { %s863_s25 = sand.u32 (!%p207_p2), 1, %s710_s19  }
  0x31   : > { %210 = sbr.rel (%p207_p2) target bundleno = 546 (0x222), region = 40  ;;  %s544_s26 = sshll.u32 (!%p207_p2), %s863_s25, 5 }
  0x32   : > { %s213_s28 = scalar_lea.sflag (!%p207_p2), [#allocation3], %s863_s25  ;;  %s216_s8 = scalar_lea.vmem (!%p207_p2), [#allocation2], %s544_s26 }
  0x38   : > { %697 = dma.done.wait (%p800_p6), %s213_s28, 512  }
  0x39   : > { %699 = vsyncadd (%p800_p6), %s213_s28, 4294966784  ;;  %v724_v0 = vmov 0.0   ;;  %v725_v1 = vmov 0   ;;  %v246_v2 = vld [vmem:[%s216_s8 + $0x8] sm:$0xff]  ;;  %v248_v3 = vld [vmem:[%s216_s8 + $0x18] sm:$0xff]  ;;  %vm256_vm0 = vcmask 130048  }
  0x3a   : > { %324 = vmatprep.mubr.f32.mxu0 %v724_v0  ;;  %613 = vset.pattern.permute.xlu0 %v725_v1  ;;  %v245_v4 = vld [vmem:[%s216_s8] sm:$0xff]  ;;  %v558_v5 = vpack.c.bf16 %v248_v3, %v246_v2  ;;  %v247_v6 = vld [vmem:[%s216_s8 + $0x10] sm:$0xff]  ;;  %vm352_vm1 = vcmask 1044480   ;;  %vm348_vm2 = vcmask 39936   ;;  %s545_s11 = sshll.u32 %s863_s25, 2  ;;  %s557_s13 = sshll.u32 %s778_s22, 6 }
  0x3b   : > { %423 = vmatprep.mubr.f32.mxu1 %v724_v0  ;;  %v250_v7 = vld [vmem:[%s934_s2] sm:$0x1f]  ;;  %v560_v8 = vpack.c.bf16 %v247_v6, %v245_v4  ;;  %s242_s17 = scalar_lea.vmem [#allocation5], %s545_s11  ;;  %s888_s8 = scalar_lea.hbm %s937_s5, %s557_s13 }
  0x3c   : > { %253 = vperm.xlu0 %613, %v250_v7   ;;  %559 = vmatprep.subr.bf16.mxu0 %v558_v5  ;;  %v342_v9 = vld [vmem:[%s936_s4] sm:$0x3]  ;;  %s467_s23 = sshll.u32 %s242_s17, 4  ;;  %s453_s12 = scalar_lea.sflag [#allocation4], %s863_s25  ;;  %s890_s23 = int_to_ptr.vmem [resolvable:$true] %s467_s23 }
  0x3d   : > { %561 = vmatpush1.bf16.msra.mxu0 %v560_v8  ;;  %v249_v10 = vld [vmem:[%s933_s1] sm:$0x1f]  ;;  %s652_s14 = scalar_lea.vmem %s890_s23, 64  ;;  %p945_p11 = scmp.ne.s32.totalorder %s941_s30, 0 }
  0x3e   : > { %v341_v26 = vld [vmem:[%s935_s3] sm:$0x3]  ;;  %p653_p6 = scmp.ne.s32.totalorder %s890_s23, %s652_s14  ;;  %s726_s22 = smov [#allocation5]  }
  0x3f   : > { %s656_s15 = sshll.u32 %s726_s22, 4  ;;  %s657_s15 = int_to_ptr.vmem [resolvable:$false] %s656_s15 }
  0x40   : > { %345 = vperm.xlu0 %613, %v342_v9   ;;  %546 = vmatmul.mubr.msk.f32.vlgmr.msra.gmra.mrb[0].mxu0 %vm256_vm0, %v249_v10  ;;  %p654_p12 = pnand %p653_p6, %p945_p11  ;;  %s658_s29 = scalar_lea.vmem %s657_s15, 128 }
  0x41   : > { %p659_p4 = scmp.lt.s32.totalorder %s890_s23, %s657_s15  ;;  %p660_p10 = scmp.lt.s32.totalorder %s658_s29, %s652_s14 }
  0x42   : > { %p655_p13 = pneg %p654_p12 }
  0x43   : > { %p661_p1 = por %p660_p10, %p659_p4 }
  0x45   : > { %p662_p3 = pnand %p661_p1, %p655_p13 }
  0xbb   : > { %v254_v11 = vpop.permute.xlu0 %253 }
  0xbf   : > { %v346_v27 = vpop.permute.xlu0 %345 }
 0x113   : > { %v326_v12 = vpop.f32.mrb[0].mxu0 }
 0x114   : > { %v327_v13 = vadd.f32 %v326_v12, %v254_v11  ;;  %v328_v14 = vpop.f32.mrb[1].mxu0 }
 0x115   : > { %v329_v15 = vadd.f32 %v328_v14, %v254_v11 }
 0x116   : > { %v333_v16 = vmul.f32 0.70710677, %v327_v13  ;;  %v331_v23 = vmul.f32 0.5, %v327_v13 }
 0x117   : > { %v334_v17 = vmul.f32 0.70710677, %v329_v15  ;;  %v332_v21 = vmul.f32 0.5, %v329_v15 }
 0x118   : > { %614 = verf.f32 %v333_v16 }
 0x119   : > { %616 = verf.f32 %v334_v17 }
 0x122   : > { %v615_v18 = vpop.eup %614 }
 0x123   : > { %v617_v19 = vpop.eup %616  ;;  %v337_v20 = vadd.f32 1.0, %v615_v18 }
 0x124   : > { %v338_v22 = vadd.f32 1.0, %v617_v19 }
 0x125   : > { %v339_v25 = vmul.f32 %v337_v20, %v331_v23 }
 0x126   : > { %v340_v24 = vmul.f32 %v338_v22, %v332_v21 }
 0x128   : > { %547 = vmatprep.subr.msk.mxu1 %vm352_vm1, %v340_v24 }
 0x129   : > { %548 = vmatpush1.msk.msra.mxu1 %vm352_vm1, %v339_v25 }
 0x12a   : > { %549 = vmatmul.mubr.msk.f32.vlgmr.msra.gmra.mrb[0].mxu1 %vm348_vm2, %v341_v26 }
 0x1fd   : > { %v425_v28 = vpop.f32.mrb[0].mxu1 }
 0x1fe   : > { %v426_v29 = vadd.f32 %v425_v28, %v346_v27  ;;  %v427_v30 = vpop.f32.mrb[1].mxu1 }
 0x1ff   : > { %v428_v31 = vadd.f32 %v427_v30, %v346_v27 }
 0x200   : > { %v432_v32 = vmul.f32 0.70710677, %v426_v29  ;;  %v430_v36 = vmul.f32 0.5, %v426_v29 }
 0x201   : > { %v433_v33 = vmul.f32 0.70710677, %v428_v31  ;;  %v431_v38 = vmul.f32 0.5, %v428_v31 }
 0x202   : > { %618 = verf.f32 %v432_v32 }
 0x203   : > { %620 = verf.f32 %v433_v33 }
 0x20c   : > { %v619_v34 = vpop.eup %618 }
 0x20d   : > { %v621_v35 = vpop.eup %620  ;;  %v436_v37 = vadd.f32 1.0, %v619_v34 }
 0x20e   : > { %v437_v39 = vadd.f32 1.0, %v621_v35 }
 0x20f   : > { %v438_v40 = vmul.f32 %v436_v37, %v430_v36 }
 0x210   : > { %v439_v41 = vmul.f32 %v437_v39, %v431_v38 }
 0x212   : > { %v442_v42 = vcombine.low %v438_v40, %v439_v41 }
 0x214   : > { %550 = vst.sshfl [vmem:[%s242_s17] sm:$0x33 pattern:$0x76325410] %v442_v42 }
 0x215   : > { %665 = shalt.err (!%p662_p3)
}
 0x216   : > { %s666_s25 = scalar_lea.hbm %s888_s8, 64  ;;  %s670_s9 = scalar_lea.hbm %s937_s5, 128 }
 0x217   : > { %p667_p5 = scmp.ne.s32.totalorder %s888_s8, %s666_s25  ;;  %p671_p9 = scmp.lt.u32.totalorder %s888_s8, %s937_s5 }
 0x218   : > { %p672_p0 = scmp.lt.u32.totalorder %s670_s9, %s666_s25  ;;  %p674_p6 = scmp.lt.u32.totalorder %s666_s25, %s888_s8 }
 0x219   : > { %p668_p7 = pnand %p667_p5, %p945_p11 }
 0x21a   : > { %p673_p2 = por %p672_p0, %p671_p9 }
 0x21b   : > { %p669_p8 = pneg %p668_p7 }
 0x21c   : > { %p675_p12 = por %p674_p6, %p673_p2 }
 0x21e   : > { %p676_p13 = pnand %p675_p12, %p669_p8 }
 0x220   : > { %679 = shalt.err (!%p676_p13)
}
 0x221   : > { %564 = dma.vmem_to_hbm [thread:$0]  (%p945_p11), %s890_s23, 64, %s888_s8, %s453_s12  }
 0x222 PF: > { %s479_s13 = sand.u32 1, %s706_s18   ;;  %p946_p4 = scmp.ne.s32.totalorder %s942_s6, 0 }
 0x223   : > { %p947_p10 = scmp.ge.s32.totalorder %s718_s21, 2  ;;  %s480_s17 = scalar_lea.sflag [#allocation4], %s479_s13 }
 0x225   : > { %p571_p1 = pnand %p947_p10, %p946_p4 }
 0x227   : > { %701 = dma.done.wait (!%p571_p1), %s480_s17, 64  }
 0x228   : > { %703 = vsyncadd (!%p571_p1), %s480_s17, 4294967232  ;;  %p18_p3 = scmp.ge.s32.totalorder %s782_s24, 4   ;;  %s948_s18 = smov %s710_s19 }
 0x229   : > { %s949_s19 = smov %s714_s20  ;;  %s950_s20 = smov %s794_s27 }
 0x22a   : > { %s951_s21 = smov %s782_s24  ;;  %20 = sbr.rel (!%p18_p3) target bundleno = 5 (0x5), region = 85 }
 0x231   :  { %485 = vsyncpa [#allocation3], 1 }
 0x232   :  { %487 = vsyncpa [#allocation3 + $0x1], 1 }
 0x233   :  { %488 = vsyncpa [#allocation4], 1 }
 0x234   :  { %490 = vsyncpa [#allocation4 + $0x1], 1 }

</bundles_post_ra>
